<compile_context>
chip_gen: v6e
topology: v6e:2x2x1
jax: 0.10.0
libtpu: 0.0.40
codegen_flags: <defaults>
</compile_context>

<pallas_src>
import numpy as np
import jax
import jax.numpy as jnp
from jax.experimental import pallas as pl
from jax.experimental.pallas import tpu as pltpu


def _fpn_s5_kernel(fl_ref, fs_ref, f5_ref, wl_ref, ws_ref, bsum_ref,
                   ublk_ref, o_ref):
    """Whole FPN_S5 head for one batch-block (Nb images folded into lanes).

    fl_ref : (c1+c2 , Nb*Ml)  channel-major [f1;f2], lane-dense
    fs_ref : (c3+c4 , Nb*Ms)  channel-major [f3;f4], lane-dense
    f5_ref : (Cout  , Nb*Ms)  lateral skip
    wl_ref : (Cout, c1+c2)    [W1|W2]
    ws_ref : (Cout, c3+c4)    [W3|W4]
    bsum   : (Cout, 1)        b1+b2+b3+b4
    ublk   : (Nb*Ms, Nb*Ml)   block-diag nearest-2x upsample (0/1, bf16)
    """
    f32 = jnp.float32
    # Small-resolution branch: ONE fused dot over the concatenated [f3;f4]
    # channels (1x1 convs commute with nearest upsampling, so they run at the
    # small resolution) plus the exact f5 skip add on the VPU.
    s = jnp.dot(ws_ref[...], fs_ref[...], preferred_element_type=f32)
    s = s + f5_ref[...].astype(f32)                          # (Cout, Nb*Ms)
    # Nearest-2x upsample of every image in the block at once, as an MXU
    # matmul against a constant 0/1 block-diagonal matrix (lane-dense result).
    lat = jnp.dot(s, ublk_ref[...].astype(f32), preferred_element_type=f32)
    # Large-resolution branch: ONE fused dot over the concatenated [f1;f2].
    acc = jnp.dot(wl_ref[...], fl_ref[...], preferred_element_type=f32)
    o_ref[...] = (acc + lat + bsum_ref[...].astype(f32)).astype(o_ref.dtype)


def _nearest_up2_matrix(hs, ws):
    """U[ms, ml] = 1 iff small pixel ms is the nearest-neighbour (scale=2)
    parent of large pixel ml, so up(s) == s @ U for s of shape (C, hs*ws)."""
    hl = np.arange(2 * hs)[:, None]                 # (2hs, 1)
    wl = np.arange(2 * ws)[None, :]                 # (1, 2ws)
    parent = (hl // 2) * ws + (wl // 2)             # (2hs, 2ws) small flat idx
    return (np.arange(hs * ws)[:, None] == parent.reshape(1, -1)
            ).astype(np.float32)                    # (hs*ws, 4*hs*ws)


def _num_batch_blocks(n, ms, ml):
    """Grid size over the batch.

    Prefer a 2-way "parallel" split (v7x has two TensorCores) when each half
    still carries enough folded work to amortize the ~600-cycle grid-step
    overhead and the per-half lane widths stay 128-aligned; otherwise fold
    the whole batch into a single grid step (best for v5e/v6e and for tiny N,
    where step overhead would dominate)."""
    if n >= 4 and n % 2 == 0:
        nb = n // 2
        if (nb * ms) % 128 == 0 and (nb * ml) % 128 == 0:
            return 2
    return 1


def fpn_s5_forward(xs_nchw, params):
    """Pallas FPN_S5 forward. xs_nchw = [f1, f2, f3, f4, f5] in NCHW
    (matching PyTorch's x[-5]..x[-1]).  params: w1..w4 as (Cout, Cin) 1x1-conv
    weights and b1..b4 as (Cout,).  Returns the NCHW output of the module."""
    f1, f2, f3, f4, f5 = xs_nchw
    n, c1, h1, w1 = f1.shape
    n2, c2, h2, w2 = f2.shape
    n3, c3, h3, w3 = f3.shape
    n4, c4, h4, w4 = f4.shape
    cout = params["w4"].shape[0]

    # ---- explicit shape validation (clear errors instead of opaque BlockSpec
    #      failures inside the kernel) ---------------------------------------
    if not (n == n2 == n3 == n4 == f5.shape[0]):
        raise ValueError("all five feature maps must share the batch dimension")
    if (h2, w2) != (h1, w1):
        raise ValueError("f2 must have the same spatial size as f1")
    if (h4, w4) != (h3, w3):
        raise ValueError("f4 must have the same spatial size as f3")
    if (h1, w1) != (2 * h3, 2 * w3):
        raise ValueError("f1/f2 must be exactly 2x the f3/f4 resolution")
    if f5.shape != (n, cout, h3, w3):
        raise ValueError("forward() requires f5 with out_channels channels at the f4 size")
    for name, cin in (("w1", c1), ("w2", c2), ("w3", c3), ("w4", c4)):
        if params[name].shape != (cout, cin):
            raise ValueError(f"params['{name}'] must have shape ({cout}, {cin})")

    ms = h3 * w3                 # small-resolution pixels per image
    ml = h1 * w1                 # large-resolution pixels per image
    dtype = f1.dtype

    g = _num_batch_blocks(n, ms, ml)   # grid steps over the batch
    nb = n // g                        # images folded per grid step

    # ---- one-time channel-major relayout (wrapper side): NCHW -> (C, N*H*W)
    #      so the batch folds into the lane axis and each resolution needs a
    #      single (Cout, Cin) @ (Cin, Nb*M) dot inside the kernel. -----------
    def to_channel_major(parts, m):
        cat = jnp.concatenate([p.reshape(n, p.shape[1], m) for p in parts],
                              axis=1)                       # (N, C, M)
        return cat.transpose(1, 0, 2).reshape(cat.shape[1], n * m)

    fl = to_channel_major([f1, f2], ml)        # (c1+c2, N*Ml)
    fs = to_channel_major([f3, f4], ms)        # (c3+c4, N*Ms)
    f5cm = to_channel_major([f5], ms)          # (Cout , N*Ms)

    # ---- fused weights / bias (hoisted once) --------------------------------
    wl = jnp.concatenate([params["w1"], params["w2"]], axis=1).astype(dtype)
    ws = jnp.concatenate([params["w3"], params["w4"]], axis=1).astype(dtype)
    bsum = (params["b1"] + params["b2"] + params["b3"] + params["b4"]
            ).reshape(cout, 1).astype(dtype)

    # Block-diagonal nearest-2x upsample matrix covering the Nb images of one
    # grid step.  Entries are 0/1, so bf16 storage is exact and halves its
    # HBM DMA / VMEM residency; it is widened to f32 inside the kernel.
    u = _nearest_up2_matrix(h3, w3)                              # (Ms, Ml)
    ublk = jnp.asarray(np.kron(np.eye(nb, dtype=np.float32), u),
                       dtype=jnp.bfloat16)                       # (Nb*Ms, Nb*Ml)

    cl_ = c1 + c2
    cs_ = c3 + c4

    def batched(ch, m):      # per-grid-step feature/output block (lane = Nb*M)
        return pl.BlockSpec((ch, nb * m), lambda i: (0, i))

    def const(r, c):         # grid-invariant operand
        # TODO(synk): for MB-scale constants (real FPN sizes) single-buffer
        # these with pipeline_mode=pl.Buffered(1) to halve their VMEM use.
        return pl.BlockSpec((r, c), lambda i: (0, 0))

    out = pl.pallas_call(
        _fpn_s5_kernel,
        out_shape=jax.ShapeDtypeStruct((cout, n * ml), dtype),
        grid_spec=pltpu.PrefetchScalarGridSpec(
            num_scalar_prefetch=0,
            grid=(g,),
            in_specs=[
                batched(cl_, ml),            # [f1;f2]  channel-major
                batched(cs_, ms),            # [f3;f4]  channel-major
                batched(cout, ms),           # f5 lateral skip
                const(cout, cl_),            # [W1|W2]
                const(cout, cs_),            # [W3|W4]
                const(cout, 1),              # b1+b2+b3+b4
                const(nb * ms, nb * ml),     # block-diag nearest-2x upsample
            ],
            out_specs=batched(cout, ml),
        ),
        compiler_params=pltpu.CompilerParams(
            dimension_semantics=("parallel",)),
    )(fl, fs, f5cm, wl, ws, bsum, ublk)

    # (Cout, N*Ml) -> NCHW
    return out.reshape(cout, n, h1, w1).transpose(1, 0, 2, 3)


def ref_forward(xs_nchw, params):
    """Pure-JAX reference mirroring the PyTorch forward exactly (NCHW)."""
    def conv(x, w, b):   # 1x1 conv, w: (Cout, Cin), b: (Cout,)
        return jnp.einsum("nchw,dc->ndhw", x, w) + b.reshape(1, -1, 1, 1)

    def up(x):
        return jnp.repeat(jnp.repeat(x, 2, axis=2), 2, axis=3)

    f1, f2, f3, f4, f5 = xs_nchw
    t4 = f5 + conv(f4, params["w4"], params["b4"])
    t4 = up(t4)
    f3u = up(f3)
    t3 = conv(f3u, params["w3"], params["b3"]) + t4
    t2 = conv(f2, params["w2"], params["b2"]) + t3
    t1 = conv(f1, params["w1"], params["b1"]) + t2
    return t1


if __name__ == "__main__":
    key = jax.random.PRNGKey(0)

    # Small shapes consistent with the module's forward:
    #   in_channels = [4, 4, 8, 16, *], out_channels = 8
    #   f1, f2: 16x16;  f3, f4: 8x8;  f5: 8x8 with out_channels channels.
    N = 2
    in_ch = [4, 4, 8, 16]      # channels of f1..f4 (f5 must have out_ch)
    out_ch = 8
    shapes = {
        "f1": (N, in_ch[0], 16, 16),
        "f2": (N, in_ch[1], 16, 16),
        "f3": (N, in_ch[2], 8, 8),
        "f4": (N, in_ch[3], 8, 8),
        "f5": (N, out_ch, 8, 8),
    }

    keys = jax.random.split(key, 16)
    xs = [
        jax.random.normal(keys[i], shapes[name], dtype=jnp.float32)
        for i, name in enumerate(["f1", "f2", "f3", "f4", "f5"])
    ]

    # Deterministic params: weights (Cout, Cin) (PyTorch 1x1 conv weight
    # squeezed), biases (Cout,).
    def make_wb(kw, kb, cin, cout, scale=0.1):
        w = scale * jax.random.normal(kw, (cout, cin), dtype=jnp.float32)
        b = scale * jax.random.normal(kb, (cout,), dtype=jnp.float32)
        return w, b

    params = {}
    params["w1"], params["b1"] = make_wb(keys[5], keys[6], in_ch[0], out_ch)
    params["w2"], params["b2"] = make_wb(keys[7], keys[8], in_ch[1], out_ch)
    params["w3"], params["b3"] = make_wb(keys[9], keys[10], in_ch[2], out_ch)
    params["w4"], params["b4"] = make_wb(keys[11], keys[12], in_ch[3], out_ch)
    # conv1by1_5 exists in __init__ but is unused in forward(); omitted on purpose.

    out = jax.block_until_ready(fpn_s5_forward(xs, params))
    ref = jax.block_until_ready(ref_forward(xs, params))

    assert out.shape == (N, out_ch, 16, 16), out.shape
    # Differences vs. the reference are associativity / MXU-pass level only
    # (same dot products, fused accumulation order).
    assert jnp.allclose(out, ref, atol=1e-4, rtol=1e-5), "mismatch vs reference"

    print("KERNEL_OK")
</pallas_src>

<mosaic_0001>
module attributes {stable_mosaic.version = 11 : i64} {
  func.func @_fpn_s5_kernel(%arg0: i32, %arg1: memref<8x512xf32, #tpu.memory_space<vmem>>, %arg2: memref<24x128xf32, #tpu.memory_space<vmem>>, %arg3: memref<8x128xf32, #tpu.memory_space<vmem>>, %arg4: memref<8x8xf32, #tpu.memory_space<vmem>>, %arg5: memref<8x24xf32, #tpu.memory_space<vmem>>, %arg6: memref<8x1xf32, #tpu.memory_space<vmem>>, %arg7: memref<128x512xbf16, #tpu.memory_space<vmem>>, %arg8: memref<8x512xf32, #tpu.memory_space<vmem>>) attributes {dimension_semantics = [#tpu.dimension_semantics<parallel>], iteration_bounds = array<i64: 1>, scalar_prefetch = 0 : i64, scratch_operands = 0 : i64, tpu.core_type = #tpu.core_type<tc>, window_params = [{transform_indices = @transform_0, window_bounds = array<i64: 8, 512>}, {transform_indices = @transform_1, window_bounds = array<i64: 24, 128>}, {transform_indices = @transform_2, window_bounds = array<i64: 8, 128>}, {pipeline_mode = #tpu.pipeline_mode<synchronous>, transform_indices = @transform_3, window_bounds = array<i64: 8, 8>}, {pipeline_mode = #tpu.pipeline_mode<synchronous>, transform_indices = @transform_4, window_bounds = array<i64: 8, 24>}, {pipeline_mode = #tpu.pipeline_mode<synchronous>, transform_indices = @transform_5, window_bounds = array<i64: 8, 1>}, {pipeline_mode = #tpu.pipeline_mode<synchronous>, transform_indices = @transform_6, window_bounds = array<i64: 128, 512>}, {transform_indices = @transform_7, window_bounds = array<i64: 8, 512>}]} {
    %c0 = arith.constant 0 : index
    %c0_0 = arith.constant 0 : index
    %0 = vector.load %arg5[%c0, %c0_0] : memref<8x24xf32, #tpu.memory_space<vmem>>, vector<8x24xf32>
    %c0_1 = arith.constant 0 : index
    %c0_2 = arith.constant 0 : index
    %1 = vector.load %arg2[%c0_1, %c0_2] : memref<24x128xf32, #tpu.memory_space<vmem>>, vector<24x128xf32>
    %cst = arith.constant dense<0.000000e+00> : vector<8x128xf32>
    %2 = tpu.matmul %0, %1, %cst {dimension_numbers = #tpu.dot_dimension_numbers<[1], [0], [0], [1], [0, 0, 1, 1], [], []>} : vector<8x24xf32>, vector<24x128xf32>, vector<8x128xf32> -> vector<8x128xf32>
    %c0_3 = arith.constant 0 : index
    %c0_4 = arith.constant 0 : index
    %3 = vector.load %arg3[%c0_3, %c0_4] : memref<8x128xf32, #tpu.memory_space<vmem>>, vector<8x128xf32>
    %4 = arith.addf %2, %3 : vector<8x128xf32>
    %c0_5 = arith.constant 0 : index
    %c0_6 = arith.constant 0 : index
    %5 = vector.load %arg7[%c0_5, %c0_6] : memref<128x512xbf16, #tpu.memory_space<vmem>>, vector<128x512xbf16>
    %6 = arith.extf %5 : vector<128x512xbf16> to vector<128x512xf32>
    %cst_7 = arith.constant dense<0.000000e+00> : vector<8x512xf32>
    %7 = tpu.matmul %4, %6, %cst_7 {dimension_numbers = #tpu.dot_dimension_numbers<[1], [0], [0], [1], [0, 0, 1, 1], [], []>} : vector<8x128xf32>, vector<128x512xf32>, vector<8x512xf32> -> vector<8x512xf32>
    %c0_8 = arith.constant 0 : index
    %c0_9 = arith.constant 0 : index
    %8 = vector.load %arg4[%c0_8, %c0_9] : memref<8x8xf32, #tpu.memory_space<vmem>>, vector<8x8xf32>
    %c0_10 = arith.constant 0 : index
    %c0_11 = arith.constant 0 : index
    %9 = vector.load %arg1[%c0_10, %c0_11] : memref<8x512xf32, #tpu.memory_space<vmem>>, vector<8x512xf32>
    %cst_12 = arith.constant dense<0.000000e+00> : vector<8x512xf32>
    %10 = tpu.matmul %8, %9, %cst_12 {dimension_numbers = #tpu.dot_dimension_numbers<[1], [0], [0], [1], [0, 0, 1, 1], [], []>} : vector<8x8xf32>, vector<8x512xf32>, vector<8x512xf32> -> vector<8x512xf32>
    %11 = arith.addf %10, %7 : vector<8x512xf32>
    %c0_13 = arith.constant 0 : index
    %c0_14 = arith.constant 0 : index
    %12 = vector.load %arg6[%c0_13, %c0_14] : memref<8x1xf32, #tpu.memory_space<vmem>>, vector<8x1xf32>
    %13 = vector.broadcast %12 : vector<8x1xf32> to vector<8x512xf32>
    %14 = arith.addf %11, %13 : vector<8x512xf32>
    %c0_15 = arith.constant 0 : index
    %c0_16 = arith.constant 0 : index
    %15 = vector.load %arg8[%c0_15, %c0_16] : memref<8x512xf32, #tpu.memory_space<vmem>>, vector<8x512xf32>
    tpu.vector_store %arg8[%c0_15, %c0_16], %14 {strides = array<i32>} : memref<8x512xf32, #tpu.memory_space<vmem>>, vector<8x512xf32>,
    return
  }
  func.func @transform_0(%arg0: i32) -> (i32, i32) {
    %c0_i32 = arith.constant 0 : i32
    %c0_i32_0 = arith.constant 0 : i32
    return %c0_i32, %arg0 : i32, i32
  }
  func.func @transform_1(%arg0: i32) -> (i32, i32) {
    %c0_i32 = arith.constant 0 : i32
    %c0_i32_0 = arith.constant 0 : i32
    return %c0_i32, %arg0 : i32, i32
  }
  func.func @transform_2(%arg0: i32) -> (i32, i32) {
    %c0_i32 = arith.constant 0 : i32
    %c0_i32_0 = arith.constant 0 : i32
    return %c0_i32, %arg0 : i32, i32
  }
  func.func @transform_3(%arg0: i32) -> (i32, i32) {
    %c0_i32 = arith.constant 0 : i32
    %c0_i32_0 = arith.constant 0 : i32
    %c0_i32_1 = arith.constant 0 : i32
    return %c0_i32, %c0_i32_0 : i32, i32
  }
  func.func @transform_4(%arg0: i32) -> (i32, i32) {
    %c0_i32 = arith.constant 0 : i32
    %c0_i32_0 = arith.constant 0 : i32
    %c0_i32_1 = arith.constant 0 : i32
    return %c0_i32, %c0_i32_0 : i32, i32
  }
  func.func @transform_5(%arg0: i32) -> (i32, i32) {
    %c0_i32 = arith.constant 0 : i32
    %c0_i32_0 = arith.constant 0 : i32
    %c0_i32_1 = arith.constant 0 : i32
    return %c0_i32, %c0_i32_0 : i32, i32
  }
  func.func @transform_6(%arg0: i32) -> (i32, i32) {
    %c0_i32 = arith.constant 0 : i32
    %c0_i32_0 = arith.constant 0 : i32
    %c0_i32_1 = arith.constant 0 : i32
    return %c0_i32, %c0_i32_0 : i32, i32
  }
  func.func @transform_7(%arg0: i32) -> (i32, i32) {
    %c0_i32 = arith.constant 0 : i32
    %c0_i32_0 = arith.constant 0 : i32
    return %c0_i32, %arg0 : i32, i32
  }
}

</mosaic_0001>

<bundles_post_ra>
// kernel: tpu_custom_call.1
= control target key start
LH: loop header
LB: loop body
LE: loop exit
PB: predicated region body
PF: predicated region fallthrough
CT: control target
= control target key end

     0   :  { %12 = vsyncpa [#allocation3], 0  ;;  %s798_s0 = inlined_call_operand.hbm [shape: f32[8,512], index: 0, kind: input, shape index: {}]   ;;  %s799_s1 = inlined_call_operand.hbm [shape: f32[24,128], index: 1, kind: input, shape index: {}]   ;;  %s800_s2 = inlined_call_operand.vmem [shape: f32[8,128], index: 2, kind: input, shape index: {}]   ;;  %s801_s3 = inlined_call_operand.hbm [shape: f32[8,8], index: 3, kind: input, shape index: {}]   ;;  %s802_s4 = inlined_call_operand.vmem [shape: f32[8,24], index: 4, kind: input, shape index: {}]   ;;  %s803_s5 = inlined_call_operand.vmem [shape: f32[8,1], index: 5, kind: input, shape index: {}]   ;;  %s804_s6 = inlined_call_operand.hbm [shape: bf16[128,512], index: 6, kind: input, shape index: {}]   ;;  %s805_s7 = inlined_call_operand.hbm [shape: f32[8,512], index: 7, kind: output, shape index: {}]  }
   0x1   :  { %13 = vsyncpa [#allocation6], 0 }
   0x2   :  { %14 = vsyncpa [#allocation9], 0 }
   0x3   :  { %15 = vsyncpa [#allocation4], 0  ;;  %s714_s24 = smov [#allocation5]  }
   0x4   :  { %s31_s25 = sshll.u32 %s714_s24, 4  ;;  %s32_s25 = int_to_ptr.vmem [resolvable:$true] %s31_s25 }
   0x5   :  { %s614_s26 = scalar_lea.vmem %s32_s25, 384  ;;  %p619_p1 = scmp.lt.s32.totalorder %s32_s25, %s32_s25 }
   0x6   :  { %p615_p0 = scmp.ne.s32.totalorder %s32_s25, %s614_s26  ;;  %p620_p2 = scmp.lt.s32.totalorder %s614_s26, %s614_s26 }
   0x8   :  { %p621_p3 = por %p620_p2, %p619_p1 }
   0xa   :  { %p622_p4 = pnand %p621_p3, %p615_p0 }
   0xc   :  { %625 = shalt.err (!%p622_p4)
}
   0xd   :  { %s715_s27 = smov 128   ;;  %s716_s28 = smov 8  }
   0xe   :  { %37 = dma.hbm_to_vmem [thread:$0]  %s799_s1, 384, %s32_s25, [#allocation6], %s715_s27, %s715_s27, %s716_s28  }
   0xf   :  { %s717_s8 = smov [#allocation2]   ;;  %s718_s10 = smov [#allocation7]  }
  0x10   :  { %s22_s9 = sshll.u32 %s717_s8, 4  ;;  %s46_s11 = sshll.u32 %s718_s10, 4  ;;  %s23_s9 = int_to_ptr.vmem [resolvable:$true] %s22_s9  ;;  %s47_s11 = int_to_ptr.vmem [resolvable:$true] %s46_s11 }
  0x11   :  { %s634_s12 = scalar_lea.vmem %s23_s9, 512  ;;  %p639_p6 = scmp.lt.s32.totalorder %s23_s9, %s23_s9 }
  0x12   :  { %p635_p5 = scmp.ne.s32.totalorder %s23_s9, %s634_s12  ;;  %p640_p7 = scmp.lt.s32.totalorder %s634_s12, %s634_s12 }
  0x14   :  { %p641_p8 = por %p640_p7, %p639_p6 }
  0x16   :  { %p642_p9 = pnand %p641_p8, %p635_p5 }
  0x18   :  { %645 = shalt.err (!%p642_p9)
}
  0x19   :  { %25 = dma.hbm_to_vmem [thread:$0]  %s798_s0, 512, %s23_s9, [#allocation3]  }
  0x1a   :  { %s654_s15 = scalar_lea.vmem %s47_s11, 128  ;;  %p659_p11 = scmp.lt.s32.totalorder %s47_s11, %s47_s11 }
  0x1b   :  { %p655_p10 = scmp.ne.s32.totalorder %s47_s11, %s654_s15  ;;  %p660_p12 = scmp.lt.s32.totalorder %s654_s15, %s654_s15 }
  0x1d   :  { %p661_p13 = por %p660_p12, %p659_p11 }
  0x1f   :  { %p662_p0 = pnand %p661_p13, %p655_p10 }
  0x21   :  { %665 = shalt.err (!%p662_p0)
}
  0x22   :  { %49 = dma.hbm_to_vmem [thread:$0]  %s801_s3, 128, %s47_s11, [#allocation6]  }
  0x23   :  { %s719_s17 = smov [#allocation8]  }
  0x24   :  { %s59_s18 = sshll.u32 %s719_s17, 4  ;;  %s60_s18 = int_to_ptr.vmem [resolvable:$true] %s59_s18 }
  0x25   :  { %s674_s19 = scalar_lea.vmem %s60_s18, 4096  ;;  %p679_p2 = scmp.lt.s32.totalorder %s60_s18, %s60_s18 }
  0x26   :  { %p675_p1 = scmp.ne.s32.totalorder %s60_s18, %s674_s19  ;;  %p680_p3 = scmp.lt.s32.totalorder %s674_s19, %s674_s19 }
  0x28   :  { %p681_p4 = por %p680_p3, %p679_p2 }
  0x2a   :  { %p682_p5 = pnand %p681_p4, %p675_p1 }
  0x2c   :  { %685 = shalt.err (!%p682_p5)
}
  0x2d   :  { %s720_s0 = smov 256   ;;  %s721_s20 = smov 16  }
  0x2e   :  { %65 = dma.hbm_to_vmem [thread:$0]  %s804_s6, 4096, %s60_s18, [#allocation9], %s720_s0, %s720_s0, %s721_s20  }
  0x2f   :  { %706 = dma.done.wait [#allocation3], 512  }
  0x30   :  { %707 = vsyncadd [#allocation3], 4294966784 }
  0x31   :  { %708 = dma.done.wait [#allocation6], 512  }
  0x32   :  { %709 = vsyncadd [#allocation6], 4294966784 }
  0x33   :  { %710 = dma.done.wait [#allocation9], 4096  }
  0x34   :  { %711 = vsyncadd [#allocation9], 4294963200  ;;  %v722_v0 = vmov 0.0   ;;  %vm723_vm0 = vmmov 0   ;;  %v81_v1 = vld [vmem:[#allocation5 + $0x10] sm:$0xff]  ;;  %v80_v2 = vld [vmem:[#allocation5 + $0x8] sm:$0xff] }
  0x35   :  { %584 = vmatprep.subr.mxu0 %v722_v0  ;;  %590 = vmatprep.mubr.msk.f32.mxu0 %vm723_vm0, %v722_v0  ;;  %v79_v3 = vld [vmem:[#allocation5] sm:$0xff]  ;;  %v187_v4 = vld [vmem:[#allocation8 + $0xf0] sm:$0xff]  ;;  %v188_v5 = vld [vmem:[#allocation8 + $0xf8] sm:$0xff]  ;;  %vm83_vm1 = vcmask 195584   ;;  %vm400_vm2 = vcmask 64512  }
  0x36   :  { %317 = vmatprep.mubr.f32.mxu1 %v722_v0  ;;  %585 = vmatpush3.msra.mxu0 %v81_v1  ;;  %v250_v6 = vunpack.c.h.bf16 %v187_v4  ;;  %v249_v7 = vunpack.c.l.bf16 %v187_v4  ;;  %v252_v8 = vunpack.c.h.bf16 %v188_v5  ;;  %v185_v9 = vld [vmem:[#allocation8 + $0xe0] sm:$0xff]  ;;  %v186_v10 = vld [vmem:[#allocation8 + $0xe8] sm:$0xff]  ;;  %v183_v11 = vld [vmem:[#allocation8 + $0xd0] sm:$0xff]  ;;  %v251_v13 = vunpack.c.l.bf16 %v188_v5 }
  0x37   :  { %586 = vmatprep.subr.mxu0 %v722_v0  ;;  %v78_v12 = vld [vmem:[%s802_s4] sm:$0xff]  ;;  %v246_v14 = vunpack.c.h.bf16 %v185_v9  ;;  %v184_v15 = vld [vmem:[#allocation8 + $0xd8] sm:$0xff]  ;;  %v245_v16 = vunpack.c.l.bf16 %v185_v9  ;;  %v248_v17 = vunpack.c.h.bf16 %v186_v10  ;;  %v247_v19 = vunpack.c.l.bf16 %v186_v10  ;;  %v182_v21 = vld [vmem:[#allocation8 + $0xc8] sm:$0xff] }
  0x38   :  { %587 = vmatpush3.msra.mxu0 %v80_v2  ;;  %253 = vmatprep.subr.mxu1 %v250_v6  ;;  %v181_v18 = vld [vmem:[#allocation8 + $0xc0] sm:$0xff]  ;;  %v242_v20 = vunpack.c.h.bf16 %v183_v11  ;;  %v241_v22 = vunpack.c.l.bf16 %v183_v11  ;;  %v244_v23 = vunpack.c.h.bf16 %v184_v15  ;;  %v179_v24 = vld [vmem:[#allocation8 + $0xb0] sm:$0xff]  ;;  %v243_v25 = vunpack.c.l.bf16 %v184_v15  ;;  %v180_v27 = vld [vmem:[#allocation8 + $0xb8] sm:$0xff] }
  0x39   :  { %588 = vmatprep.subr.mxu0 %v722_v0  ;;  %254 = vmatpush1.msra.mxu1 %v249_v7  ;;  %v238_v26 = vunpack.c.h.bf16 %v181_v18  ;;  %v237_v28 = vunpack.c.l.bf16 %v181_v18  ;;  %v240_v29 = vunpack.c.h.bf16 %v182_v21  ;;  %v177_v30 = vld [vmem:[#allocation8 + $0xa0] sm:$0xff]  ;;  %v239_v31 = vunpack.c.l.bf16 %v182_v21  ;;  %v178_v33 = vld [vmem:[#allocation8 + $0xa8] sm:$0xff]  ;;  %v175_v36 = vld [vmem:[#allocation8 + $0x90] sm:$0xff] }
  0x3a   :  { %589 = vmatpush3.msra.mxu0 %v79_v3  ;;  %255 = vmatprep.subr.mxu1 %v246_v14  ;;  %v234_v32 = vunpack.c.h.bf16 %v179_v24  ;;  %v233_v34 = vunpack.c.l.bf16 %v179_v24  ;;  %v236_v35 = vunpack.c.h.bf16 %v180_v27  ;;  %v235_v37 = vunpack.c.l.bf16 %v180_v27  ;;  %v176_v39 = vld [vmem:[#allocation8 + $0x98] sm:$0xff]  ;;  %v173_v42 = vld [vmem:[#allocation8 + $0x80] sm:$0xff]  ;;  %v174_v45 = vld [vmem:[#allocation8 + $0x88] sm:$0xff] }
  0x3b   :  { %591 = vmatmul.mubr.msk.f32.vlgmr.msra.gmra.mxu0 %vm83_vm1, %v78_v12  ;;  %324 = vmatprep.subr.mxu0 %v252_v8  ;;  %v230_v38 = vunpack.c.h.bf16 %v177_v30  ;;  %v229_v40 = vunpack.c.l.bf16 %v177_v30  ;;  %v232_v41 = vunpack.c.h.bf16 %v178_v33  ;;  %v231_v43 = vunpack.c.l.bf16 %v178_v33  ;;  %v171_v48 = vld [vmem:[#allocation8 + $0x70] sm:$0xff]  ;;  %v172_v51 = vld [vmem:[#allocation8 + $0x78] sm:$0xff]  ;;  %v169_v54 = vld [vmem:[#allocation8 + $0x60] sm:$0xff] }
  0x3c   :  { %325 = vmatpush1.msra.mxu0 %v251_v13  ;;  %256 = vmatpush1.msra.mxu1 %v245_v16  ;;  %v226_v44 = vunpack.c.h.bf16 %v175_v36  ;;  %v225_v46 = vunpack.c.l.bf16 %v175_v36  ;;  %v228_v47 = vunpack.c.h.bf16 %v176_v39  ;;  %v227_v49 = vunpack.c.l.bf16 %v176_v39  ;;  %v170_v57 = vld [vmem:[#allocation8 + $0x68] sm:$0xff]  ;;  %v167_v60 = vld [vmem:[#allocation8 + $0x50] sm:$0xff]  ;;  %v168_v63 = vld [vmem:[#allocation8 + $0x58] sm:$0xff] }
  0x3d   :  { %326 = vmatprep.subr.mxu0 %v248_v17  ;;  %257 = vmatprep.subr.mxu1 %v242_v20  ;;  %v222_v50 = vunpack.c.h.bf16 %v173_v42  ;;  %v221_v52 = vunpack.c.l.bf16 %v173_v42  ;;  %v224_v53 = vunpack.c.h.bf16 %v174_v45  ;;  %v223_v55 = vunpack.c.l.bf16 %v174_v45  ;;  %v165_v3 = vld [vmem:[#allocation8 + $0x40] sm:$0xff]  ;;  %v166_v6 = vld [vmem:[#allocation8 + $0x48] sm:$0xff]  ;;  %v163_v9 = vld [vmem:[#allocation8 + $0x30] sm:$0xff] }
  0x3e   :  { %327 = vmatpush1.msra.mxu0 %v247_v19  ;;  %258 = vmatpush1.msra.mxu1 %v241_v22  ;;  %v218_v56 = vunpack.c.h.bf16 %v171_v48  ;;  %v217_v58 = vunpack.c.l.bf16 %v171_v48  ;;  %v220_v59 = vunpack.c.h.bf16 %v172_v51  ;;  %v219_v61 = vunpack.c.l.bf16 %v172_v51  ;;  %v164_v12 = vld [vmem:[#allocation8 + $0x38] sm:$0xff]  ;;  %v161_v15 = vld [vmem:[#allocation8 + $0x20] sm:$0xff]  ;;  %v162_v18 = vld [vmem:[#allocation8 + $0x28] sm:$0xff] }
  0x3f   :  { %328 = vmatprep.subr.mxu0 %v244_v23  ;;  %259 = vmatprep.subr.mxu1 %v238_v26  ;;  %v214_v62 = vunpack.c.h.bf16 %v169_v54  ;;  %v213_v1 = vunpack.c.l.bf16 %v169_v54  ;;  %v216_v2 = vunpack.c.h.bf16 %v170_v57  ;;  %v215_v4 = vunpack.c.l.bf16 %v170_v57  ;;  %v159_v21 = vld [vmem:[#allocation8 + $0x10] sm:$0xff]  ;;  %v160_v24 = vld [vmem:[#allocation8 + $0x18] sm:$0xff]  ;;  %v158_v33 = vld [vmem:[#allocation8 + $0x8] sm:$0xff] }
  0x40   :  { %329 = vmatpush1.msra.mxu0 %v243_v25  ;;  %260 = vmatpush1.msra.mxu1 %v237_v28  ;;  %v210_v5 = vunpack.c.h.bf16 %v167_v60  ;;  %v209_v7 = vunpack.c.l.bf16 %v167_v60  ;;  %v212_v8 = vunpack.c.h.bf16 %v168_v63  ;;  %v211_v10 = vunpack.c.l.bf16 %v168_v63  ;;  %v546_v39 = vld [vmem:[%s803_s5] sm:$0xff]  ;;  %v398_v48 = vld [vmem:[#allocation2 + $0x10] sm:$0xff] }
  0x41   :  { %330 = vmatprep.subr.mxu0 %v240_v29  ;;  %261 = vmatprep.subr.mxu1 %v234_v32  ;;  %v206_v11 = vunpack.c.h.bf16 %v165_v3  ;;  %v205_v13 = vunpack.c.l.bf16 %v165_v3  ;;  %v208_v14 = vunpack.c.h.bf16 %v166_v6  ;;  %v207_v16 = vunpack.c.l.bf16 %v166_v6  ;;  %v157_v32 = vld [vmem:[#allocation8] sm:$0xff] }
  0x42   :  { %331 = vmatpush1.msra.mxu0 %v239_v31  ;;  %262 = vmatpush1.msra.mxu1 %v233_v34  ;;  %v202_v17 = vunpack.c.h.bf16 %v163_v9  ;;  %v201_v19 = vunpack.c.l.bf16 %v163_v9  ;;  %v204_v20 = vunpack.c.h.bf16 %v164_v12  ;;  %v203_v22 = vunpack.c.l.bf16 %v164_v12 }
  0x43   :  { %332 = vmatprep.subr.mxu0 %v236_v35  ;;  %263 = vmatprep.subr.mxu1 %v230_v38  ;;  %v198_v23 = vunpack.c.h.bf16 %v161_v15  ;;  %v197_v25 = vunpack.c.l.bf16 %v161_v15  ;;  %v200_v26 = vunpack.c.h.bf16 %v162_v18  ;;  %v199_v27 = vunpack.c.l.bf16 %v162_v18  ;;  %v397_v38 = vld [vmem:[#allocation2 + $0x8] sm:$0xff] }
  0x44   :  { %333 = vmatpush1.msra.mxu0 %v235_v37  ;;  %264 = vmatpush1.msra.mxu1 %v229_v40  ;;  %v194_v28 = vunpack.c.h.bf16 %v159_v21  ;;  %v193_v29 = vunpack.c.l.bf16 %v159_v21  ;;  %v196_v30 = vunpack.c.h.bf16 %v160_v24  ;;  %v195_v31 = vunpack.c.l.bf16 %v160_v24 }
  0x45   :  { %334 = vmatprep.subr.mxu0 %v232_v41  ;;  %265 = vmatprep.subr.mxu1 %v226_v44  ;;  %v190_v34 = vunpack.c.h.bf16 %v157_v32  ;;  %v192_v35 = vunpack.c.h.bf16 %v158_v33  ;;  %v189_v36 = vunpack.c.l.bf16 %v157_v32  ;;  %v191_v37 = vunpack.c.l.bf16 %v158_v33  ;;  %v82_v41 = vld [vmem:[%s800_s2] sm:$0xff]  ;;  %s725_s2 = smov [#allocation10]  }
  0x46   :  { %335 = vmatpush1.msra.mxu0 %v231_v43  ;;  %266 = vmatpush1.msra.mxu1 %v225_v46  ;;  %v724_v40 = vmov 0   ;;  %v396_v44 = vld [vmem:[#allocation2] sm:$0xff]  ;;  %v399_v46 = vld [vmem:[#allocation2 + $0x18] sm:$0xff]  ;;  %s566_s5 = sshll.u32 %s725_s2, 4  ;;  %s567_s5 = int_to_ptr.vmem [resolvable:$true] %s566_s5 }
  0x47   :  { %336 = vmatprep.subr.mxu0 %v228_v47  ;;  %267 = vmatprep.subr.mxu1 %v222_v50  ;;  %v395_v47 = vld [vmem:[#allocation7] sm:$0xff]  ;;  %s686_s26 = scalar_lea.vmem %s567_s5, 512  ;;  %p691_p7 = scmp.lt.s32.totalorder %s567_s5, %s567_s5 }
  0x48   :  { %337 = vmatpush1.msra.mxu0 %v227_v49  ;;  %268 = vmatpush1.msra.mxu1 %v221_v52  ;;  %p687_p6 = scmp.ne.s32.totalorder %s567_s5, %s686_s26  ;;  %p692_p8 = scmp.lt.s32.totalorder %s686_s26, %s686_s26 }
  0x49   :  { %338 = vmatprep.subr.mxu0 %v224_v53  ;;  %269 = vmatprep.subr.mxu1 %v218_v56 }
  0x4a   :  { %339 = vmatpush1.msra.mxu0 %v223_v55  ;;  %270 = vmatpush1.msra.mxu1 %v217_v58  ;;  %p693_p9 = por %p692_p8, %p691_p7 }
  0x4b   :  { %340 = vmatprep.subr.mxu0 %v220_v59  ;;  %271 = vmatprep.subr.mxu1 %v214_v62 }
  0x4c   :  { %341 = vmatpush1.msra.mxu0 %v219_v61  ;;  %272 = vmatpush1.msra.mxu1 %v213_v1  ;;  %p694_p10 = pnand %p693_p9, %p687_p6 }
  0x4d   :  { %342 = vmatprep.subr.mxu0 %v216_v2  ;;  %273 = vmatprep.subr.mxu1 %v210_v5 }
  0x4e   :  { %343 = vmatpush1.msra.mxu0 %v215_v4  ;;  %274 = vmatpush1.msra.mxu1 %v209_v7 }
  0x4f   :  { %344 = vmatprep.subr.mxu0 %v212_v8  ;;  %275 = vmatprep.subr.mxu1 %v206_v11 }
  0x50   :  { %345 = vmatpush1.msra.mxu0 %v211_v10  ;;  %276 = vmatpush1.msra.mxu1 %v205_v13 }
  0x51   :  { %346 = vmatprep.subr.mxu0 %v208_v14  ;;  %277 = vmatprep.subr.mxu1 %v202_v17 }
  0x52   :  { %347 = vmatpush1.msra.mxu0 %v207_v16  ;;  %278 = vmatpush1.msra.mxu1 %v201_v19 }
  0x53   :  { %348 = vmatprep.subr.mxu0 %v204_v20  ;;  %279 = vmatprep.subr.mxu1 %v198_v23 }
  0x54   :  { %349 = vmatpush1.msra.mxu0 %v203_v22  ;;  %280 = vmatpush1.msra.mxu1 %v197_v25 }
  0x55   :  { %350 = vmatprep.subr.mxu0 %v200_v26  ;;  %281 = vmatprep.subr.mxu1 %v194_v28 }
  0x56   :  { %351 = vmatpush1.msra.mxu0 %v199_v27  ;;  %282 = vmatpush1.msra.mxu1 %v193_v29 }
  0x57   :  { %352 = vmatprep.subr.mxu0 %v196_v30  ;;  %388 = vmatprep.mubr.f32.mxu0 %v722_v0 }
  0x58   :  { %353 = vmatpush1.msra.mxu0 %v195_v31  ;;  %283 = vmatprep.subr.mxu1 %v190_v34 }
  0x59   :  { %354 = vmatprep.subr.mxu0 %v192_v35  ;;  %284 = vmatpush1.msra.mxu1 %v189_v36 }
  0x5a   :  { %355 = vmatpush1.msra.mxu0 %v191_v37  ;;  %434 = vmatprep.subr.mxu1 %v397_v38 }
  0x5b   :  { %605 = vset.pattern.permute.xlu0 %v724_v40 }
  0x5c   :  { %549 = vperm.xlu0 %605, %v546_v39  }
  0xd7   :  { %v550_v52 = vpop.permute.xlu0 %549 }
  0xfb   :  { %v153_v42 = vpop.f32.mrf.mxu0 }
  0xfc   :  { %v154_v43 = vadd.f32 %v153_v42, %v82_v41 }
  0xfd   :  { %v592_v45 = vpop.f32.mrf.mxu0 }
  0xfe   :  { %318 = vmatmul.mubr.f32.vlgmr.msra.gmra.mxu1 %v154_v43  ;;  %389 = vmatmul.mubr.f32.vlgmr.msra.gmra.mxu0 %v154_v43 }
  0xff   :  { %435 = vmatpush1.msra.mxu1 %v396_v44  ;;  %468 = vmatprep.mubr.f32.mxu1 %v722_v0 }
 0x100   :  { %505 = vmatprep.subr.mxu1 %v399_v46 }
 0x102   :  { %578 = vmatmul.mubr.msk.f32.vlgmr.msra.gmra.mxu1 %vm400_vm2, %v395_v47 }
 0x103   :  { %506 = vmatpush1.msra.mxu1 %v398_v48  ;;  %539 = vmatprep.mubr.f32.mxu1 %v722_v0 }
 0x106   :  { %579 = vmatmul.mubr.msk.f32.vlgmr.msra.gmra.mxu1 %vm400_vm2, %v395_v47 }
 0x1be   :  { %v319_v49 = vpop.f32.mrf.mxu1  ;;  %v390_v54 = vpop.f32.mrf.mxu0 }
 0x1c0   :  { %v321_v50 = vpop.f32.mrf.mxu1  ;;  %v392_v61 = vpop.f32.mrf.mxu0 }
 0x1c2   :  { %v470_v51 = vpop.f32.mrf.mxu1 }
 0x1c3   :  { %v471_v53 = vadd.f32 %v470_v51, %v319_v49 }
 0x1c4   :  { %v472_v55 = vpop.f32.mrf.mxu1 }
 0x1c5   :  { %v552_v56 = vadd.f32 %v550_v52, %v471_v53  ;;  %v473_v57 = vadd.f32 %v472_v55, %v321_v50 }
 0x1c6   :  { %v541_v58 = vpop.f32.mrf.mxu1 }
 0x1c7   :  { %556 = vst [vmem:[#allocation10] sm:$0xff] %v552_v56  ;;  %v553_v59 = vadd.f32 %v550_v52, %v473_v57  ;;  %v542_v60 = vadd.f32 %v541_v58, %v390_v54 }
 0x1c8   :  { %v543_v62 = vpop.f32.mrf.mxu1 }
 0x1c9   :  { %557 = vst [vmem:[#allocation10 + $0x8] sm:$0xff] %v553_v59  ;;  %v554_v0 = vadd.f32 %v550_v52, %v542_v60  ;;  %v544_v63 = vadd.f32 %v543_v62, %v392_v61 }
 0x1cb   :  { %558 = vst [vmem:[#allocation10 + $0x10] sm:$0xff] %v554_v0  ;;  %v555_v1 = vadd.f32 %v550_v52, %v544_v63 }
 0x1cd   :  { %559 = vst [vmem:[#allocation10 + $0x18] sm:$0xff] %v555_v1 }
 0x1ce   :  { %697 = shalt.err (!%p694_p10)
}
 0x1cf   :  { %569 = dma.vmem_to_hbm [thread:$0]  %s567_s5, 512, %s805_s7, [#allocation4]  }
 0x1d0   :  { %712 = dma.done.wait [#allocation4], 512  }
 0x1d1   :  { %713 = vsyncadd [#allocation4], 4294966784 }
 0x1d2   :  { %573 = vsyncpa [#allocation3], 1 }
 0x1d3   :  { %574 = vsyncpa [#allocation6], 1 }
 0x1d4   :  { %575 = vsyncpa [#allocation9], 1 }
 0x1d5   :  { %576 = vsyncpa [#allocation4], 1 }

</bundles_post_ra>
